<compile_context>
chip_gen: v5e
topology: v5e:2x2
jax: 0.10.0
libtpu: 0.0.40
codegen_flags: <defaults>
</compile_context>

<pallas_src>
import functools

import jax
import jax.numpy as jnp
from jax.experimental import pallas as pl
from jax.experimental.pallas import tpu as pltpu

VMEM_LIMIT = 48 * 1024 * 1024  # safe on v5e/v6e (128 MiB) and v7x (64 MiB)


# ----------------------------------------------------------------------------
# helpers
# ----------------------------------------------------------------------------
def _tile(dim, target, align):
    """Largest block <= target that exactly divides `dim` and is a multiple of
    `align` (keeps BlockSpecs (8,128)-legal); falls back to the full dim."""
    if dim <= target:
        return dim
    t = (min(target, dim) // align) * align
    while t >= align:
        if dim % t == 0:
            return t
        t -= align
    # TODO(synk): ragged dims fall back to a single full-dim block; pad such
    # weights to x128 (as done for the vocab head) for production sizes.
    return dim


# ----------------------------------------------------------------------------
# Fused linear: o = act(x @ w + b) [+ residual] [ -> LayerNorm second output ]
# ----------------------------------------------------------------------------
def _linear_kernel(x_ref, w_ref, b_ref, *rest, activation, has_residual,
                   has_ln, eps):
    i = 0
    r_ref = g_ref = be_ref = ln_ref = None
    if has_residual:
        r_ref = rest[i]; i += 1
    if has_ln:
        g_ref, be_ref = rest[i], rest[i + 1]; i += 2
    o_ref = rest[i]; i += 1
    if has_ln:
        ln_ref = rest[i]; i += 1
    acc_ref = rest[i]

    @pl.when(pl.program_id(2) == 0)
    def _():
        acc_ref[...] = jnp.zeros_like(acc_ref)

    # bf16 x bf16 -> f32 accumulate on the MXU (no per-step casts)
    acc_ref[...] += jnp.dot(x_ref[...], w_ref[...],
                            preferred_element_type=jnp.float32)

    @pl.when(pl.program_id(2) == pl.num_programs(2) - 1)
    def _():
        y = acc_ref[...] + b_ref[...].astype(jnp.float32)
        if activation == "quick_gelu":
            # CLIP QuickGELU: x * sigmoid(1.702 * x), kept in f32 (EUP sigmoid)
            y = y * jax.nn.sigmoid(1.702 * y)
        if has_residual:
            y = y + r_ref[...].astype(jnp.float32)
        o_ref[...] = y.astype(o_ref.dtype)
        if has_ln:
            # full feature row is resident (tn == N), so LN fuses here
            mean = jnp.mean(y, axis=-1, keepdims=True)
            var = jnp.mean(jnp.square(y - mean), axis=-1, keepdims=True)
            ln = (y - mean) * jax.lax.rsqrt(var + eps)
            ln = (ln * g_ref[...].astype(jnp.float32)
                  + be_ref[...].astype(jnp.float32))
            ln_ref[...] = ln.astype(ln_ref.dtype)


def pallas_linear(x, w, b, activation=None, residual=None,
                  ln_gamma=None, ln_beta=None, ln_eps=1e-5,
                  out_dtype=jnp.bfloat16, tm=256, tn=1024, tk=1024):
    M, K = x.shape
    K2, N = w.shape
    assert K == K2
    has_res = residual is not None
    has_ln = ln_gamma is not None
    if has_ln:
        tn = N  # LayerNorm epilogue needs the whole feature row resident
    tm = _tile(M, tm, 8)
    tn = _tile(N, tn, 128)
    tk = _tile(K, tk, 128)
    grid = (M // tm, N // tn, K // tk)

    in_specs = [
        pl.BlockSpec((tm, tk), lambda i, j, k: (i, k)),
        pl.BlockSpec((tk, tn), lambda i, j, k: (k, j)),
        pl.BlockSpec((1, tn), lambda i, j, k: (0, j)),
    ]
    inputs = [x, w, b.reshape(1, N)]
    if has_res:
        in_specs.append(pl.BlockSpec((tm, tn), lambda i, j, k: (i, j)))
        inputs.append(residual)
    if has_ln:
        in_specs += [pl.BlockSpec((1, tn), lambda i, j, k: (0, j))] * 2
        inputs += [ln_gamma.reshape(1, N), ln_beta.reshape(1, N)]

    out_shape = [jax.ShapeDtypeStruct((M, N), out_dtype)]
    out_specs = [pl.BlockSpec((tm, tn), lambda i, j, k: (i, j))]
    if has_ln:
        out_shape.append(jax.ShapeDtypeStruct((M, N), out_dtype))
        out_specs.append(pl.BlockSpec((tm, tn), lambda i, j, k: (i, j)))

    out_isz = jnp.dtype(out_dtype).itemsize
    bytes_accessed = (x.dtype.itemsize * M * K + w.dtype.itemsize * K * N
                      + 4 * N + out_isz * M * N * len(out_shape)
                      + (residual.dtype.itemsize * M * N if has_res else 0))
    cost = pl.CostEstimate(
        flops=2 * M * N * K,
        transcendentals=(M * N if activation == "quick_gelu" else 0),
        bytes_accessed=bytes_accessed)

    return pl.pallas_call(
        functools.partial(_linear_kernel, activation=activation,
                          has_residual=has_res, has_ln=has_ln, eps=ln_eps),
        out_shape=tuple(out_shape) if has_ln else out_shape[0],
        grid=grid,
        in_specs=in_specs,
        out_specs=tuple(out_specs) if has_ln else out_specs[0],
        scratch_shapes=[pltpu.VMEM((tm, tn), jnp.float32)],
        compiler_params=pltpu.CompilerParams(
            dimension_semantics=("parallel", "parallel", "arbitrary"),
            vmem_limit_bytes=VMEM_LIMIT),
        cost_estimate=cost,
    )(*inputs)


# ----------------------------------------------------------------------------
# Standalone LayerNorm (only used once, on the raw embeddings)
# ----------------------------------------------------------------------------
def _layernorm_kernel(x_ref, g_ref, b_ref, o_ref, *, eps):
    x = x_ref[...].astype(jnp.float32)
    mean = jnp.mean(x, axis=-1, keepdims=True)
    var = jnp.mean(jnp.square(x - mean), axis=-1, keepdims=True)
    y = (x - mean) * jax.lax.rsqrt(var + eps)
    o_ref[...] = (y * g_ref[...] + b_ref[...]).astype(o_ref.dtype)


def pallas_layernorm(x, gamma, beta, eps=1e-5, out_dtype=jnp.bfloat16):
    M, D = x.shape
    tm = _tile(M, 1024, 8)   # mem-bound: big row tiles (~85% of HBM roofline)
    return pl.pallas_call(
        functools.partial(_layernorm_kernel, eps=eps),
        out_shape=jax.ShapeDtypeStruct((M, D), out_dtype),
        grid=(M // tm,),
        in_specs=[
            pl.BlockSpec((tm, D), lambda i: (i, 0)),
            pl.BlockSpec((1, D), lambda i: (0, 0)),
            pl.BlockSpec((1, D), lambda i: (0, 0)),
        ],
        out_specs=pl.BlockSpec((tm, D), lambda i: (i, 0)),
        compiler_params=pltpu.CompilerParams(
            dimension_semantics=("parallel",),
            vmem_limit_bytes=VMEM_LIMIT),
    )(x, gamma.reshape(1, D), beta.reshape(1, D))


# ----------------------------------------------------------------------------
# Attention: (B, H) grid, per-head Q/K/V blocks delivered by BlockSpecs
# ----------------------------------------------------------------------------
def _attention_kernel(q_ref, k_ref, v_ref, o_ref):
    q = q_ref[0, 0]                                  # [L, Dh] bf16 (scale folded into W_q)
    k = k_ref[0, 0]
    v = v_ref[0, 0]
    s = jax.lax.dot_general(q, k, (((1,), (1,)), ((), ())),
                            preferred_element_type=jnp.float32)   # [L, L]
    m = jnp.max(s, axis=-1, keepdims=True)
    p = jnp.exp(s - m)
    p = p * pl.reciprocal(jnp.sum(p, axis=-1, keepdims=True), approx=True)
    o = jnp.dot(p.astype(jnp.bfloat16), v, preferred_element_type=jnp.float32)
    o_ref[0, 0] = o.astype(o_ref.dtype)


def pallas_attention(q, k, v):
    B, H, L, Dh = q.shape
    cost = pl.CostEstimate(
        flops=4 * B * H * L * L * Dh,
        transcendentals=B * H * L * L,
        bytes_accessed=2 * 4 * B * H * L * Dh)
    spec = pl.BlockSpec((1, 1, L, Dh), lambda b, h: (b, h, 0, 0))
    return pl.pallas_call(
        _attention_kernel,
        out_shape=jax.ShapeDtypeStruct((B, H, L, Dh), jnp.bfloat16),
        grid=(B, H),
        in_specs=[spec, spec, spec],
        out_specs=spec,
        compiler_params=pltpu.CompilerParams(
            dimension_semantics=("parallel", "parallel"),
            vmem_limit_bytes=VMEM_LIMIT),
        cost_estimate=cost,
    )(q, k, v)


def multihead_attention(qkv_flat, B, L, H, Dh):
    """Self-attention over the fused [B*L, 3*H*Dh] bf16 QKV projection
    (attn_mask=None in the reference: no padding / causal mask)."""
    D = H * Dh
    # TODO(synk): when Dh is a 128-multiple the per-head Q/K/V blocks can be
    # delivered straight out of the fused slab via BlockSpec index maps; for
    # generality (Dh=8 here, 64 for real BERT) we pay one small bf16 transpose.
    qkv = qkv_flat.reshape(B, L, 3, H, Dh)
    qkv = jnp.transpose(qkv, (2, 0, 3, 1, 4))          # [3, B, H, L, Dh]
    out = pallas_attention(qkv[0], qkv[1], qkv[2])     # [B, H, L, Dh] bf16
    return jnp.transpose(out, (0, 2, 1, 3)).reshape(B * L, D)


# ----------------------------------------------------------------------------
# Fused vocab head: linear + online log-softmax + target NLL (no logits slab)
# ----------------------------------------------------------------------------
def _ce_head_kernel(x_ref, w_ref, b_ref, tgt_ref, nll_ref, m_sc, l_sc, t_sc,
                    *, tn, vocab):
    j = pl.program_id(1)

    @pl.when(j == 0)
    def _():
        m_sc[...] = jnp.full_like(m_sc, -1e30)
        l_sc[...] = jnp.zeros_like(l_sc)
        t_sc[...] = jnp.zeros_like(t_sc)

    logits = jnp.dot(x_ref[...], w_ref[...],
                     preferred_element_type=jnp.float32) + b_ref[...]
    col = j * tn + jax.lax.broadcasted_iota(jnp.int32, logits.shape, 1)
    logits = jnp.where(col < vocab, logits, -1e30)     # mask padded vocab cols

    # target-logit contribution for this vocab tile (each target hits one tile)
    t_sc[...] += jnp.sum(jnp.where(col == tgt_ref[...], logits, 0.0),
                         axis=-1, keepdims=True)

    # online log-sum-exp across vocab tiles
    m_new = jnp.maximum(m_sc[...], jnp.max(logits, axis=-1, keepdims=True))
    l_sc[...] = (l_sc[...] * jnp.exp(m_sc[...] - m_new)
                 + jnp.sum(jnp.exp(logits - m_new), axis=-1, keepdims=True))
    m_sc[...] = m_new

    @pl.when(j == pl.num_programs(1) - 1)
    def _():
        nll_ref[...] = m_sc[...] + jnp.log(l_sc[...]) - t_sc[...]


def pallas_ce_head(rows, targets, w_pad, b_pad, vocab, tm=256, tn=1024):
    cap, D = rows.shape
    _, Vp = w_pad.shape
    tm = _tile(cap, tm, 8)
    tn = _tile(Vp, tn, 128)
    grid = (cap // tm, Vp // tn)
    cost = pl.CostEstimate(
        flops=2 * cap * Vp * D,
        transcendentals=cap * Vp,
        bytes_accessed=2 * cap * D + 2 * D * Vp + 4 * Vp + 8 * cap)
    # TODO(synk): pipeline_mode=pl.Buffered(3) on the weight spec would hide a
    # bit more weight-stream DMA latency when cap is small.
    nll = pl.pallas_call(
        functools.partial(_ce_head_kernel, tn=tn, vocab=vocab),
        out_shape=jax.ShapeDtypeStruct((cap, 1), jnp.float32),
        grid=grid,
        in_specs=[
            pl.BlockSpec((tm, D), lambda i, j: (i, 0)),
            pl.BlockSpec((D, tn), lambda i, j: (0, j)),
            pl.BlockSpec((1, tn), lambda i, j: (0, j)),
            pl.BlockSpec((tm, 1), lambda i, j: (i, 0)),
        ],
        out_specs=pl.BlockSpec((tm, 1), lambda i, j: (i, 0)),
        scratch_shapes=[pltpu.VMEM((tm, 1), jnp.float32)] * 3,
        compiler_params=pltpu.CompilerParams(
            dimension_semantics=("parallel", "arbitrary"),
            vmem_limit_bytes=VMEM_LIMIT),
        cost_estimate=cost,
    )(rows, w_pad, b_pad.reshape(1, Vp),
      targets.reshape(cap, 1).astype(jnp.int32))
    return nll[:, 0]


# ----------------------------------------------------------------------------
# Model (parameters + forward), mirroring the PyTorch BERT module
# ----------------------------------------------------------------------------
class DummyTokenizer:
    pad_token_id = 0
    begin_token_id = 1
    end_token_id = 2
    mask_token_id = 3

    def __init__(self, vocab_size):
        self._vocab = vocab_size

    def get_vocab_size(self):
        return self._vocab


def init_params(key, vocab_size, context_length, width, n_heads, n_layers):
    proj_std = width ** (-0.5) * (2 * n_layers) ** (-0.5)
    attn_std = width ** (-0.5)
    fc_std = (2 * width) ** (-0.5)
    head_dim = width // n_heads
    scale = head_dim ** (-0.5)
    vocab_pad = ((vocab_size + 127) // 128) * 128   # lane-pad the vocab head

    keys = iter(jax.random.split(key, 3 + 4 * n_layers))
    bf16 = jnp.bfloat16  # matmul weights bf16 (MXU inputs); biases / LN f32
    proj_w = attn_std * jax.random.normal(next(keys), (width, vocab_size),
                                          jnp.float32)
    params = {
        "token_embedding": 0.02 * jax.random.normal(
            next(keys), (vocab_size, width), jnp.float32),
        "positional_embedding": 0.01 * jax.random.normal(
            next(keys), (context_length, width), jnp.float32),
        "ln_final": {"g": jnp.ones((width,), jnp.float32),
                     "b": jnp.zeros((width,), jnp.float32)},
        "proj": {
            "w": jnp.pad(proj_w, ((0, 0), (0, vocab_pad - vocab_size))).astype(bf16),
            "b": jnp.zeros((vocab_pad,), jnp.float32),
            "vocab": vocab_size,
        },
        "blocks": [],
    }
    for _ in range(n_layers):
        k0, k1, k2, k3 = (next(keys) for _ in range(4))
        # attn in_proj: [D, 3D] (pre-transposed for x @ W); 1/sqrt(Dh) folded
        # into the Q columns so attention does no in-kernel scaling.
        attn_in_w = attn_std * jax.random.normal(k0, (width, 3 * width), jnp.float32)
        attn_in_w = attn_in_w.at[:, :width].multiply(scale)
        blk = {
            "ln_1": {"g": jnp.ones((width,), jnp.float32),
                     "b": jnp.zeros((width,), jnp.float32)},
            "ln_2": {"g": jnp.ones((width,), jnp.float32),
                     "b": jnp.zeros((width,), jnp.float32)},
            "attn_in_w": attn_in_w.astype(bf16),
            "attn_in_b": jnp.zeros((3 * width,), jnp.float32),
            "attn_out_w": (proj_std * jax.random.normal(
                k1, (width, width), jnp.float32)).astype(bf16),
            "attn_out_b": jnp.zeros((width,), jnp.float32),
            "c_fc_w": (fc_std * jax.random.normal(
                k2, (width, 4 * width), jnp.float32)).astype(bf16),
            "c_fc_b": jnp.zeros((4 * width,), jnp.float32),
            "c_proj_w": (proj_std * jax.random.normal(
                k3, (4 * width, width), jnp.float32)).astype(bf16),
            "c_proj_b": jnp.zeros((width,), jnp.float32),
        }
        params["blocks"].append(blk)
    return params


def residual_block(x_flat, h_ln1, blk, next_g, next_b, B, L, D, H):
    """x = x + out_proj(attn(ln_1(x))); x = x + c_proj(qgelu(c_fc(ln_2(x)))).
    The residual adds AND the next LayerNorm are fused into the out_proj /
    c_proj epilogues; h_ln1 is ln_1(x) from the previous fused epilogue."""
    Dh = D // H
    qkv = pallas_linear(h_ln1, blk["attn_in_w"], blk["attn_in_b"])      # [B*L,3D] bf16
    attn = multihead_attention(qkv, B, L, H, Dh)                        # [B*L, D] bf16
    x_flat, h_ln2 = pallas_linear(attn, blk["attn_out_w"], blk["attn_out_b"],
                                  residual=x_flat,
                                  ln_gamma=blk["ln_2"]["g"],
                                  ln_beta=blk["ln_2"]["b"])
    f = pallas_linear(h_ln2, blk["c_fc_w"], blk["c_fc_b"],
                      activation="quick_gelu")                          # [B*L,4D] bf16
    x_flat, h_next = pallas_linear(f, blk["c_proj_w"], blk["c_proj_b"],
                                   residual=x_flat,
                                   ln_gamma=next_g, ln_beta=next_b)
    return x_flat, h_next


def embed(params, input_ids, n_heads):
    """token+pos embedding -> transformer -> ln_final; returns [B*L, D] bf16."""
    B, L = input_ids.shape
    D = params["token_embedding"].shape[1]
    x = jnp.take(params["token_embedding"], input_ids, axis=0)          # [B, L, D]
    x = x + params["positional_embedding"][None, :L, :]
    x_flat = x.reshape(B * L, D).astype(jnp.float32)   # (the [L,B,D] permute in the
    blocks = params["blocks"]                          #  reference is a no-op for the
    n = len(blocks)                                    #  math: attention is per-batch)
    h = pallas_layernorm(x_flat, blocks[0]["ln_1"]["g"], blocks[0]["ln_1"]["b"])
    for i, blk in enumerate(blocks):
        if i + 1 < n:
            ng, nb = blocks[i + 1]["ln_1"]["g"], blocks[i + 1]["ln_1"]["b"]
        else:
            ng, nb = params["ln_final"]["g"], params["ln_final"]["b"]
        x_flat, h = residual_block(x_flat, h, blk, ng, nb, B, L, D, n_heads)
    return h   # == ln_final(x), bf16, [B*L, D]


def mlm_forward(params, tokenizer, inputs, mlm_probability, n_heads, rng,
                max_masked_tokens=None):
    """Equivalent of BERT.forward(inputs) -> masked_lm_loss."""
    targets = inputs
    B, L = inputs.shape
    vocab = params["proj"]["vocab"]

    k1, k2, k3, k4 = jax.random.split(rng, 4)
    masked = jax.random.bernoulli(k1, mlm_probability, (B, L))
    special = ((inputs == tokenizer.pad_token_id)
               | (inputs == tokenizer.begin_token_id)
               | (inputs == tokenizer.end_token_id))
    masked = masked & (~special)

    replaced = jax.random.bernoulli(k2, 0.8, (B, L)) & masked
    input_ids = jnp.where(replaced, tokenizer.mask_token_id, inputs)
    random_sel = jax.random.bernoulli(k3, 0.5, (B, L)) & masked & (~replaced)
    random_words = jax.random.randint(k4, (B, L), 0, vocab)
    input_ids = jnp.where(random_sel, random_words, input_ids)

    h = embed(params, input_ids, n_heads)               # ln_final out, [B*L, D] bf16

    # vocab head only on (gathered) masked rows; the static cap defaults to
    # B*L so semantics are exact, production can lower it.
    masked_flat = masked.reshape(B * L)
    cap = B * L if max_masked_tokens is None else max_masked_tokens
    cap = max(8, ((cap + 7) // 8) * 8)
    (idx,) = jnp.nonzero(masked_flat, size=cap, fill_value=0)
    n_found = jnp.minimum(jnp.sum(masked_flat), cap)
    valid = (jnp.arange(cap) < n_found).astype(jnp.float32)
    rows = jnp.take(h, idx, axis=0)                     # [cap, D] bf16
    tgt = jnp.take(targets.reshape(B * L), idx)         # [cap]

    # fused projection + log-softmax + target NLL (logits never hit HBM)
    nll = pallas_ce_head(rows, tgt, params["proj"]["w"], params["proj"]["b"], vocab)

    n_valid = jnp.maximum(jnp.sum(valid), 1.0)          # mean over rows actually used
    loss = jnp.sum(nll * valid) / n_valid
    return loss


# ----------------------------------------------------------------------------
if __name__ == "__main__":
    # small config consistent with the module's __init__
    VOCAB = 128
    CONTEXT_LEN = 16
    WIDTH = 32
    N_HEADS = 4
    N_LAYERS = 2
    BATCH = 2
    MLM_P = 0.15

    tokenizer = DummyTokenizer(VOCAB)

    root = jax.random.PRNGKey(0)
    k_params, k_ids, k_mask = jax.random.split(root, 3)
    params = init_params(k_params, VOCAB, CONTEXT_LEN, WIDTH, N_HEADS, N_LAYERS)

    # deterministic example token ids: [begin, content..., end, pads]
    content = jax.random.randint(k_ids, (BATCH, CONTEXT_LEN), 4, VOCAB)
    ids = content.at[:, 0].set(tokenizer.begin_token_id)
    ids = ids.at[:, CONTEXT_LEN - 3].set(tokenizer.end_token_id)
    ids = ids.at[:, CONTEXT_LEN - 2:].set(tokenizer.pad_token_id)
    ids = ids.astype(jnp.int32)

    loss = mlm_forward(params, tokenizer, ids, MLM_P, N_HEADS, k_mask)
    loss = jax.block_until_ready(loss)
    assert jnp.isfinite(loss), "loss is not finite"
    print("KERNEL_OK")
</pallas_src>

<mosaic_0001>
module attributes {stable_mosaic.version = 11 : i64} {
  func.func @_layernorm_kernel(%arg0: i32, %arg1: memref<32x32xf32, #tpu.memory_space<vmem>>, %arg2: memref<1x32xf32, #tpu.memory_space<vmem>>, %arg3: memref<1x32xf32, #tpu.memory_space<vmem>>, %arg4: memref<32x32xbf16, #tpu.memory_space<vmem>>) attributes {dimension_semantics = [#tpu.dimension_semantics<parallel>], iteration_bounds = array<i64: 1>, scalar_prefetch = 0 : i64, scratch_operands = 0 : i64, tpu.core_type = #tpu.core_type<tc>, window_params = [{transform_indices = @transform_0, window_bounds = array<i64: 32, 32>}, {pipeline_mode = #tpu.pipeline_mode<synchronous>, transform_indices = @transform_1, window_bounds = array<i64: 1, 32>}, {pipeline_mode = #tpu.pipeline_mode<synchronous>, transform_indices = @transform_2, window_bounds = array<i64: 1, 32>}, {transform_indices = @transform_3, window_bounds = array<i64: 32, 32>}]} {
    %c0 = arith.constant 0 : index
    %c0_0 = arith.constant 0 : index
    %0 = vector.load %arg1[%c0, %c0_0] : memref<32x32xf32, #tpu.memory_space<vmem>>, vector<32x32xf32>
    %cst = arith.constant dense<0.000000e+00> : vector<32xf32>
    %1 = vector.multi_reduction <add>, %0, %cst [1] : vector<32x32xf32> to vector<32xf32>
    %2 = vector.shape_cast %1 : vector<32xf32> to vector<32x1xf32>
    %cst_1 = arith.constant 3.200000e+01 : f32
    %3 = vector.broadcast %cst_1 : f32 to vector<32x1xf32>
    %4 = arith.divf %2, %3 : vector<32x1xf32>
    %5 = vector.broadcast %4 : vector<32x1xf32> to vector<32x32xf32>
    %6 = arith.subf %0, %5 : vector<32x32xf32>
    %7 = arith.mulf %6, %6 : vector<32x32xf32>
    %cst_2 = arith.constant dense<0.000000e+00> : vector<32xf32>
    %8 = vector.multi_reduction <add>, %7, %cst_2 [1] : vector<32x32xf32> to vector<32xf32>
    %9 = vector.shape_cast %8 : vector<32xf32> to vector<32x1xf32>
    %cst_3 = arith.constant 3.200000e+01 : f32
    %10 = vector.broadcast %cst_3 : f32 to vector<32x1xf32>
    %11 = arith.divf %9, %10 : vector<32x1xf32>
    %12 = vector.broadcast %4 : vector<32x1xf32> to vector<32x32xf32>
    %13 = arith.subf %0, %12 : vector<32x32xf32>
    %cst_4 = arith.constant 9.99999974E-6 : f32
    %14 = vector.broadcast %cst_4 : f32 to vector<32x1xf32>
    %15 = arith.addf %11, %14 : vector<32x1xf32>
    %16 = math.rsqrt %15 : vector<32x1xf32>
    %17 = vector.broadcast %16 : vector<32x1xf32> to vector<32x32xf32>
    %18 = arith.mulf %13, %17 : vector<32x32xf32>
    %c0_5 = arith.constant 0 : index
    %c0_6 = arith.constant 0 : index
    %19 = vector.load %arg2[%c0_5, %c0_6] : memref<1x32xf32, #tpu.memory_space<vmem>>, vector<1x32xf32>
    %20 = vector.broadcast %19 : vector<1x32xf32> to vector<32x32xf32>
    %21 = arith.mulf %18, %20 : vector<32x32xf32>
    %c0_7 = arith.constant 0 : index
    %c0_8 = arith.constant 0 : index
    %22 = vector.load %arg3[%c0_7, %c0_8] : memref<1x32xf32, #tpu.memory_space<vmem>>, vector<1x32xf32>
    %23 = vector.broadcast %22 : vector<1x32xf32> to vector<32x32xf32>
    %24 = arith.addf %21, %23 : vector<32x32xf32>
    %25 = arith.truncf %24 : vector<32x32xf32> to vector<32x32xbf16>
    %c0_9 = arith.constant 0 : index
    %c0_10 = arith.constant 0 : index
    %26 = vector.load %arg4[%c0_9, %c0_10] : memref<32x32xbf16, #tpu.memory_space<vmem>>, vector<32x32xbf16>
    tpu.vector_store %arg4[%c0_9, %c0_10], %25 {strides = array<i32>} : memref<32x32xbf16, #tpu.memory_space<vmem>>, vector<32x32xbf16>,
    return
  }
  func.func @transform_0(%arg0: i32) -> (i32, i32) {
    %c0_i32 = arith.constant 0 : i32
    %c0_i32_0 = arith.constant 0 : i32
    return %arg0, %c0_i32 : i32, i32
  }
  func.func @transform_1(%arg0: i32) -> (i32, i32) {
    %c0_i32 = arith.constant 0 : i32
    %c0_i32_0 = arith.constant 0 : i32
    %c0_i32_1 = arith.constant 0 : i32
    return %c0_i32, %c0_i32_0 : i32, i32
  }
  func.func @transform_2(%arg0: i32) -> (i32, i32) {
    %c0_i32 = arith.constant 0 : i32
    %c0_i32_0 = arith.constant 0 : i32
    %c0_i32_1 = arith.constant 0 : i32
    return %c0_i32, %c0_i32_0 : i32, i32
  }
  func.func @transform_3(%arg0: i32) -> (i32, i32) {
    %c0_i32 = arith.constant 0 : i32
    %c0_i32_0 = arith.constant 0 : i32
    return %arg0, %c0_i32 : i32, i32
  }
}

</mosaic_0001>

<bundles_post_ra>
// kernel: tpu_custom_call.1
= control target key start
LH: loop header
LB: loop body
LE: loop exit
PB: predicated region body
PF: predicated region fallthrough
CT: control target
= control target key end

     0   :  { %8 = vsyncpa [#allocation3], 0  ;;  %s355_s0 = inlined_call_operand.hbm [shape: f32[32,32], index: 0, kind: input, shape index: {}]   ;;  %s356_s1 = inlined_call_operand.hbm [shape: f32[1,32], index: 1, kind: input, shape index: {}]   ;;  %s357_s2 = inlined_call_operand.vmem [shape: f32[1,32], index: 2, kind: input, shape index: {}]   ;;  %s358_s3 = inlined_call_operand.hbm [shape: bf16[32,32], index: 3, kind: output, shape index: {}]  }
   0x1   :  { %9 = vsyncpa [#allocation6], 0 }
   0x2   :  { %10 = vsyncpa [#allocation4], 0  ;;  %s15_s14 = sshll.u32 %s355_s0, 4  ;;  %s288_s15 = smov [#allocation2]   ;;  %s16_s14 = int_to_ptr.hbm [resolvable:$true] %s15_s14 }
   0x3   :  { %s17_s16 = sshll.u32 %s288_s15, 4  ;;  %s29_s19 = sshll.u32 %s356_s1, 4  ;;  %s18_s16 = int_to_ptr.vmem [resolvable:$true] %s17_s16  ;;  %s30_s19 = int_to_ptr.hbm [resolvable:$true] %s29_s19 }
   0x4   :  { %s289_s20 = smov 128   ;;  %s290_s21 = smov 8  }
   0x5   :  { %23 = dma.hbm_to_vmem [thread:$0]  %s16_s14, 512, %s18_s16, [#allocation3], %s289_s20, %s289_s20, %s290_s21  }
   0x6   :  { %s291_s22 = smov [#allocation5]  }
   0x7   :  { %s31_s23 = sshll.u32 %s291_s22, 4  ;;  %s32_s23 = int_to_ptr.vmem [resolvable:$true] %s31_s23 }
   0x8   :  { %34 = dma.hbm_to_vmem [thread:$0]  %s30_s19, 16, %s32_s23, [#allocation6]  }
   0x9   :  { %282 = dma.done.wait [#allocation3], 512  }
   0xa   :  { %283 = vsyncadd [#allocation3], 4294966784 }
   0xb   :  { %284 = dma.done.wait [#allocation6], 16  }
   0xc   :  { %285 = vsyncadd [#allocation6], 4294967280  ;;  %vm49_vm0 = vcmask 261120   ;;  %v47_v0 = vld [vmem:[#allocation2 + $0x10] sm:$0xff]  ;;  %v45_v1 = vld [vmem:[#allocation2] sm:$0xff]  ;;  %v292_v8 = vmov 32.0  }
   0xd   :  { %v56_v2 = vsel %vm49_vm0, %v47_v0, 0.0  ;;  %v50_v3 = vsel %vm49_vm0, %v45_v1, 0.0  ;;  %v48_v4 = vld [vmem:[#allocation2 + $0x18] sm:$0xff]  ;;  %v46_v5 = vld [vmem:[#allocation2 + $0x8] sm:$0xff]  ;;  %200 = vrcp.f32 %v292_v8  ;;  %v198_v61 = vld [vmem:[#allocation5] ss:$0 sm:$0xff] }
   0xe   :  { %57 = vadd.xlane.f32.xlu1 %v56_v2  ;;  %51 = vadd.xlane.f32.xlu0 %v50_v3  ;;  %v59_v6 = vsel %vm49_vm0, %v48_v4, 0.0  ;;  %v53_v7 = vsel %vm49_vm0, %v46_v5, 0.0  ;;  %v199_v2 = vld [vmem:[%s357_s2] ss:$0 sm:$0xff]  ;;  %vm165_vm10 = vcmask 257024   ;;  %s293_s2 = smov [#allocation7]  }
   0xf   :  { %s174_s24 = sshll.u32 %s293_s2, 4  ;;  %s176_s27 = sshll.u32 %s358_s3, 4  ;;  %s175_s24 = int_to_ptr.vmem [resolvable:$true] %s174_s24  ;;  %s177_s27 = int_to_ptr.hbm [resolvable:$true] %s176_s27 }
  0x10   :  { %s294_s28 = smov 64   ;;  %s295_s29 = smov 4  }
  0x13   :  { %v201_v9 = vpop.eup %200 }
  0x14   :  { %v63_v10 = vmul.f32 32.0, %v201_v9  ;;  %vm67_vm1 = vweird.f32 %v201_v9 }
  0x16   :  { %60 = vadd.xlane.f32.xlu1 %v59_v6  ;;  %54 = vadd.xlane.f32.xlu0 %v53_v7  ;;  %v64_v11 = vsub.f32 1.0, %v63_v10 }
  0x18   :  { %v65_v12 = vmul.f32 %v201_v9, %v64_v11 }
  0x1a   :  { %v66_v13 = vadd.f32 %v201_v9, %v65_v12 }
  0x1c   :  { %v68_v14 = vsel %vm67_vm1, %v201_v9, %v66_v13 }
  0x81   :  { %v58_v15 = vpop.xlane.xlu1 %57  ;;  %v52_v16 = vpop.xlane.xlu0 %51 }
  0x82   :  { %v71_v17 = vmul.f32 %v68_v14, %v58_v15  ;;  %v69_v18 = vmul.f32 %v68_v14, %v52_v16 }
  0x84   :  { %v326_v19 = vsub.f32 %v47_v0, %v71_v17  ;;  %v73_v20 = vsub.f32 %v45_v1, %v69_v18 }
  0x86   :  { %v79_v21 = vmul.f32 %v326_v19, %v326_v19  ;;  %v77_v22 = vmul.f32 %v73_v20, %v73_v20 }
  0x88   :  { %v87_v23 = vsel %vm49_vm0, %v79_v21, 0.0  ;;  %v81_v24 = vsel %vm49_vm0, %v77_v22, 0.0 }
  0x89   :  { %v61_v25 = vpop.xlane.xlu1 %60  ;;  %88 = vadd.xlane.f32.xlu0 %v87_v23  ;;  %82 = vadd.xlane.f32.xlu2 %v81_v24  ;;  %v55_v26 = vpop.xlane.xlu0 %54 }
  0x8a   :  { %v72_v27 = vmul.f32 %v68_v14, %v61_v25  ;;  %v70_v28 = vmul.f32 %v68_v14, %v55_v26 }
  0x8c   :  { %v332_v29 = vsub.f32 %v48_v4, %v72_v27  ;;  %v334_v30 = vsub.f32 %v46_v5, %v70_v28 }
  0x8e   :  { %v80_v31 = vmul.f32 %v332_v29, %v332_v29  ;;  %v78_v32 = vmul.f32 %v334_v30, %v334_v30 }
  0x90   :  { %v90_v33 = vsel %vm49_vm0, %v80_v31, 0.0  ;;  %v84_v34 = vsel %vm49_vm0, %v78_v32, 0.0 }
  0x91   :  { %91 = vadd.xlane.f32.xlu1 %v90_v33  ;;  %85 = vadd.xlane.f32.xlu2 %v84_v34 }
  0xfc   :  { %v83_v35 = vpop.xlane.xlu2 %82  ;;  %v89_v36 = vpop.xlane.xlu0 %88 }
  0xfd   :  { %v93_v37 = vmul.f32 %v83_v35, %v68_v14  ;;  %v95_v38 = vmul.f32 %v89_v36, %v68_v14 }
  0xff   :  { %v97_v39 = vadd.f32 1e-05, %v93_v37  ;;  %v99_v40 = vadd.f32 1e-05, %v95_v38 }
 0x101   :  { %202 = vrsqrt.f32 %v97_v39  ;;  %vm107_vm4 = vweird.f32 %v97_v39  ;;  %vm127_vm6 = vweird.f32 %v99_v40 }
 0x102   :  { %204 = vrsqrt.f32 %v99_v40 }
 0x104   :  { %v92_v41 = vpop.xlane.xlu1 %91  ;;  %v86_v42 = vpop.xlane.xlu2 %85 }
 0x105   :  { %v96_v43 = vmul.f32 %v92_v41, %v68_v14  ;;  %v94_v44 = vmul.f32 %v86_v42, %v68_v14 }
 0x107   :  { %v203_v45 = vpop.eup %202  ;;  %v100_v46 = vadd.f32 1e-05, %v96_v43  ;;  %v98_v47 = vadd.f32 1e-05, %v94_v44 }
 0x108   :  { %v205_v48 = vpop.eup %204  ;;  %v102_v49 = vmul.f32 %v203_v45, %v97_v39  ;;  %vm108_vm2 = vweird.f32 %v203_v45 }
 0x109   :  { %v122_v50 = vmul.f32 %v205_v48, %v99_v40  ;;  %206 = vrsqrt.f32 %v100_v46  ;;  %vm128_vm3 = vweird.f32 %v205_v48  ;;  %vm109_vm5 = vmor %vm107_vm4, %vm108_vm2  ;;  %vm137_vm11 = vweird.f32 %v100_v46 }
 0x10a   :  { %v103_v51 = vmul.f32 %v203_v45, %v102_v49  ;;  %208 = vrsqrt.f32 %v98_v47  ;;  %vm129_vm7 = vmor %vm127_vm6, %vm128_vm3  ;;  %vm117_vm13 = vweird.f32 %v98_v47 }
 0x10b   :  { %v123_v52 = vmul.f32 %v205_v48, %v122_v50 }
 0x10c   :  { %v104_v53 = vmul.f32 0.5, %v103_v51 }
 0x10d   :  { %v124_v54 = vmul.f32 0.5, %v123_v52 }
 0x10e   :  { %v105_v55 = vsub.f32 1.5, %v104_v53 }
 0x10f   :  { %v207_v56 = vpop.eup %206  ;;  %v125_v57 = vsub.f32 1.5, %v124_v54 }
 0x110   :  { %v209_v58 = vpop.eup %208  ;;  %v106_v59 = vmul.f32 %v203_v45, %v105_v55  ;;  %v132_v60 = vmul.f32 %v207_v56, %v100_v46  ;;  %vm138_vm8 = vweird.f32 %v207_v56 }
 0x111   :  { %v126_v62 = vmul.f32 %v205_v48, %v125_v57  ;;  %v112_v63 = vmul.f32 %v209_v58, %v98_v47  ;;  %vm118_vm9 = vweird.f32 %v209_v58  ;;  %vm139_vm12 = vmor %vm137_vm11, %vm138_vm8 }
 0x112   :  { %v110_v0 = vsel %vm109_vm5, %v203_v45, %v106_v59  ;;  %v133_v1 = vmul.f32 %v207_v56, %v132_v60  ;;  %vm119_vm14 = vmor %vm117_vm13, %vm118_vm9 }
 0x113   :  { %v141_v3 = vmul.f32 %v110_v0, %v73_v20  ;;  %v130_v4 = vsel %vm129_vm7, %v205_v48, %v126_v62  ;;  %v113_v5 = vmul.f32 %v209_v58, %v112_v63 }
 0x114   :  { %v143_v6 = vmul.f32 %v130_v4, %v326_v19  ;;  %v134_v7 = vmul.f32 0.5, %v133_v1 }
 0x115   :  { %v149_v8 = vmul.f32 %v198_v61, %v141_v3  ;;  %v114_v9 = vmul.f32 0.5, %v113_v5 }
 0x116   :  { %v151_v10 = vmul.f32 %v198_v61, %v143_v6  ;;  %v135_v11 = vsub.f32 1.5, %v134_v7 }
 0x117   :  { %v157_v12 = vadd.f32 %v199_v2, %v149_v8  ;;  %v115_v13 = vsub.f32 1.5, %v114_v9 }
 0x118   :  { %v159_v14 = vadd.f32 %v199_v2, %v151_v10  ;;  %v136_v15 = vmul.f32 %v207_v56, %v135_v11 }
 0x119   :  { %v161_v16 = vpack.c.bf16 %v157_v12, %v157_v12  ;;  %v116_v17 = vmul.f32 %v209_v58, %v115_v13 }
 0x11a   :  { %v163_v18 = vpack.c.bf16 %v159_v14, %v159_v14  ;;  %v140_v20 = vsel %vm139_vm12, %v207_v56, %v136_v15 }
 0x11b   :  { %166 = vst.msk [vmem:[#allocation7] sm:$0xf] %vm165_vm10, %v161_v16  ;;  %v144_v19 = vmul.f32 %v140_v20, %v332_v29  ;;  %v120_v21 = vsel %vm119_vm14, %v209_v58, %v116_v17 }
 0x11c   :  { %168 = vst.msk [vmem:[#allocation7 + $0x8] sm:$0xf] %vm165_vm10, %v163_v18  ;;  %v142_v22 = vmul.f32 %v120_v21, %v334_v30 }
 0x11d   :  { %v152_v23 = vmul.f32 %v198_v61, %v144_v19 }
 0x11e   :  { %v150_v24 = vmul.f32 %v198_v61, %v142_v22 }
 0x11f   :  { %v160_v25 = vadd.f32 %v199_v2, %v152_v23 }
 0x120   :  { %v158_v26 = vadd.f32 %v199_v2, %v150_v24 }
 0x121   :  { %v164_v27 = vpack.c.bf16 %v160_v25, %v160_v25 }
 0x122   :  { %v162_v28 = vpack.c.bf16 %v158_v26, %v158_v26 }
 0x123   :  { %169 = vst.msk [vmem:[#allocation7 + $0xc] sm:$0xf] %vm165_vm10, %v164_v27 }
 0x124   :  { %167 = vst.msk [vmem:[#allocation7 + $0x4] sm:$0xf] %vm165_vm10, %v162_v28 }
 0x125   :  { %182 = dma.vmem_to_hbm [thread:$0]  %s175_s24, 256, %s177_s27, [#allocation4], %s294_s28, %s294_s28, %s295_s29  }
 0x126   :  { %286 = dma.done.wait [#allocation4], 256  }
 0x127   :  { %287 = vsyncadd [#allocation4], 4294967040 }
 0x128   :  { %187 = vsyncpa [#allocation3], 1 }
 0x129   :  { %188 = vsyncpa [#allocation6], 1 }
 0x12a   :  { %189 = vsyncpa [#allocation4], 1 }

</bundles_post_ra>
